<compile_context>
chip_gen: v6e
topology: v6e:2x2x1
jax: 0.10.0
libtpu: 0.0.40
codegen_flags: <defaults>
</compile_context>

<pallas_src>
import functools

import jax
import jax.numpy as jnp
from jax import lax
from jax.experimental import pallas as pl
from jax.experimental.pallas import tpu as pltpu

BN_EPS = 1e-5
_HI = lax.Precision.HIGHEST
_SQRT_HALF = 0.7071067811865476


def _ghost_bn(h, gamma, beta):
    """Train-mode BatchNorm per ghost batch. h: (CH, L, F), stats over axis=1."""
    mean = jnp.mean(h, axis=1, keepdims=True)
    var = jnp.mean(jnp.square(h - mean), axis=1, keepdims=True)  # biased, >= 0
    s = gamma * lax.rsqrt(var + BN_EPS)        # folded scale   (CH, 1, F)
    t = beta - mean * s                        # folded shift   (CH, 1, F)
    return h * s + t


def feature_block_kernel(num_glu, is_first, out_dims, x_ref, *refs):
    """Runs the full GLU chain on a block of CH ghost batches (one grid step)."""
    out_ref = refs[-1]
    p = refs[:-1]  # 3 refs per GLU block: W (in, 2*out), gamma (1, 2*out), beta (1, 2*out)

    ch, clen, _ = x_ref.shape
    scale = jnp.float32(_SQRT_HALF)
    x = x_ref[...]  # (CH, L, in) f32

    def glu(x3, i):
        w = p[3 * i + 0][...]       # (in_d, 2*out)
        gamma = p[3 * i + 1][...]   # (1, 2*out)
        beta = p[3 * i + 2][...]    # (1, 2*out)
        in_d = w.shape[0]
        # One fused matmul over all CH ghost batches (M = CH*clen); default
        # precision (~3-pass f32 on the MXU) with f32 accumulation.
        h = jnp.dot(x3.reshape(ch * clen, in_d), w,
                    preferred_element_type=jnp.float32)
        h = h.reshape(ch, clen, 2 * out_dims)      # copy-free: clen % 8 == 0
        hn = _ghost_bn(h, gamma, beta)
        # GLU split: within-vreg lane slice of the fused (2*out)-wide result.
        return hn[..., :out_dims] * jax.nn.sigmoid(hn[..., out_dims:])

    start = 0
    if is_first:
        x = glu(x, 0)
        start = 1
    for i in range(start, num_glu):  # static unroll: full LLO scheduler visibility
        x = (x + glu(x, i)) * scale

    out_ref[...] = x.astype(out_ref.dtype)


def _chunks_per_step(n_chunks, chunk_len, row_limit=1024):
    """Largest divisor of n_chunks within the row budget that (when possible)
    keeps >= 2 grid steps so v7x can split the grid across its 2 TensorCores."""
    min_steps = 2 if n_chunks >= 2 else 1
    best = 1
    for d in range(1, n_chunks + 1):
        if (n_chunks % d == 0 and d * chunk_len <= row_limit
                and n_chunks // d >= min_steps):
            best = d
    return best


def feature_block_forward(x, params, virtual_batch_size, is_first):
    """params: list of (W (in, 2*out), gamma (1, 2*out), beta (1, 2*out)) per GLU."""
    B, in_dims = x.shape
    num_glu = len(params)
    out_dims = params[0][0].shape[1] // 2
    assert is_first or in_dims == out_dims, (
        "is_first=False requires in_dims == out_dims for the residual add")

    # Ghost-batch chunking exactly like torch.chunk(n_chunks, dim=0).
    n_chunks = max(B // virtual_batch_size, 1)
    chunk_len = -(-B // n_chunks)  # ceil
    assert n_chunks * chunk_len == B, (
        "chunk-tiled kernel requires an evenly divisible batch")
    assert chunk_len % 8 == 0, (
        "virtual_batch_size must be a multiple of 8 (f32 sublane tile) so the "
        "blocked per-chunk BN view is copy-free")

    ch = _chunks_per_step(n_chunks, chunk_len)   # ghost batches per grid step
    grid = (n_chunks // ch,)

    x3 = x.astype(jnp.float32).reshape(n_chunks, chunk_len, in_dims)

    flat_params = []
    in_specs = [pl.BlockSpec((ch, chunk_len, in_dims), lambda i: (i, 0, 0))]
    flops = 0
    transcendentals = 0
    bytes_accessed = x3.size * 4 + B * out_dims * 4
    for (W, gamma, beta) in params:
        in_d = W.shape[0]
        flat_params += [
            W.astype(jnp.float32),                                   # (in_d, 2*out)
            gamma.astype(jnp.float32).reshape(1, 2 * out_dims),
            beta.astype(jnp.float32).reshape(1, 2 * out_dims),
        ]
        # Replicated (constant index_map) parameter refs; tiny at these dims.
        # (Single-buffering them via pipeline_mode only matters once dims grow
        #  into the hundreds and VMEM on v5e/v7x becomes the constraint.)
        in_specs += [
            pl.BlockSpec((in_d, 2 * out_dims), lambda i: (0, 0)),
            pl.BlockSpec((1, 2 * out_dims), lambda i: (0, 0)),
            pl.BlockSpec((1, 2 * out_dims), lambda i: (0, 0)),
        ]
        flops += 2 * B * in_d * (2 * out_dims)
        transcendentals += B * out_dims + n_chunks * 2 * out_dims  # sigmoid + rsqrt
        bytes_accessed += (W.size + gamma.size + beta.size) * 4

    kernel = functools.partial(feature_block_kernel, num_glu, is_first, out_dims)
    out3 = pl.pallas_call(
        kernel,
        out_shape=jax.ShapeDtypeStruct((n_chunks, chunk_len, out_dims), jnp.float32),
        grid=grid,
        in_specs=in_specs,
        out_specs=pl.BlockSpec((ch, chunk_len, out_dims), lambda i: (i, 0, 0)),
        compiler_params=pltpu.CompilerParams(
            dimension_semantics=("parallel",)),  # megacore sharding on v7x
        cost_estimate=pl.CostEstimate(
            flops=int(flops),
            transcendentals=int(transcendentals),
            bytes_accessed=int(bytes_accessed)),
    )(x3, *flat_params)
    return out3.reshape(B, out_dims)


def feature_block_reference(x, params, virtual_batch_size, is_first):
    """Pure-JAX reference mirroring the PyTorch module (train-mode GhostBN),
    full f32 (HIGHEST) matmuls."""
    def glu(x, w, gamma, beta):
        h = jnp.dot(x, w, precision=_HI)
        B = h.shape[0]
        n_chunks = max(B // virtual_batch_size, 1)
        chunk_len = -(-B // n_chunks)
        outs = []
        for c in range(n_chunks):
            hc = h[c * chunk_len:(c + 1) * chunk_len]
            mu = hc.mean(0, keepdims=True)
            var = ((hc - mu) ** 2).mean(0, keepdims=True)
            outs.append((hc - mu) / jnp.sqrt(var + BN_EPS))
        hn = jnp.concatenate(outs, 0) * gamma + beta
        o = w.shape[1] // 2
        return hn[:, :o] * jax.nn.sigmoid(hn[:, o:])

    scale = jnp.sqrt(jnp.float32(0.5))
    s = 0
    if is_first:
        x = glu(x, *params[0])
        s = 1
    for i in range(s, len(params)):
        x = (x + glu(x, *params[i])) * scale
    return x


if __name__ == "__main__":
    # Small shapes consistent with the module; virtual_batch_size is a multiple
    # of 8 and the grid has 2 steps after blocking (4 ghost batches per step).
    B = 64
    input_dims = 16
    output_dims = 16
    num_glu = 2
    is_first = True
    virtual_batch_size = 8  # -> 8 ghost batches of 8 rows

    key = jax.random.PRNGKey(0)
    key, kx = jax.random.split(key)
    x = jax.random.normal(kx, (B, input_dims), dtype=jnp.float32)

    # Deterministic synthetic parameters (shapes from GLUBlock.__init__).
    params = []
    for i in range(num_glu):
        in_d = input_dims if i == 0 else output_dims
        key, kw, kg, kb = jax.random.split(key, 4)
        W = jax.random.normal(kw, (in_d, 2 * output_dims), jnp.float32) / jnp.sqrt(
            jnp.float32(in_d))
        gamma = 1.0 + 0.1 * jax.random.normal(kg, (1, 2 * output_dims), jnp.float32)
        beta = 0.1 * jax.random.normal(kb, (1, 2 * output_dims), jnp.float32)
        params.append((W, gamma, beta))

    out = feature_block_forward(x, params, virtual_batch_size, is_first)
    out = jax.block_until_ready(out)

    ref = jax.block_until_ready(
        feature_block_reference(x, params, virtual_batch_size, is_first))

    assert out.shape == (B, output_dims)
    # Default-precision (multi-pass f32) kernel matmuls vs HIGHEST reference:
    # observed error is orders of magnitude below this tolerance at K=16/32.
    assert bool(jnp.allclose(out, ref, rtol=1e-4, atol=1e-4)), (
        "mismatch vs reference: max abs err = "
        f"{float(jnp.max(jnp.abs(out - ref)))}")

    print("KERNEL_OK")
</pallas_src>

<mosaic_0001>
module attributes {stable_mosaic.version = 11 : i64} {
  func.func @feature_block_kernel(%arg0: i32, %arg1: memref<4x8x16xf32, #tpu.memory_space<vmem>>, %arg2: memref<16x32xf32, #tpu.memory_space<vmem>>, %arg3: memref<1x32xf32, #tpu.memory_space<vmem>>, %arg4: memref<1x32xf32, #tpu.memory_space<vmem>>, %arg5: memref<16x32xf32, #tpu.memory_space<vmem>>, %arg6: memref<1x32xf32, #tpu.memory_space<vmem>>, %arg7: memref<1x32xf32, #tpu.memory_space<vmem>>, %arg8: memref<4x8x16xf32, #tpu.memory_space<vmem>>) attributes {dimension_semantics = [#tpu.dimension_semantics<parallel>], iteration_bounds = array<i64: 2>, scalar_prefetch = 0 : i64, scratch_operands = 0 : i64, tpu.core_type = #tpu.core_type<tc>, window_params = [{transform_indices = @transform_0, window_bounds = array<i64: 4, 8, 16>}, {pipeline_mode = #tpu.pipeline_mode<synchronous>, transform_indices = @transform_1, window_bounds = array<i64: 16, 32>}, {pipeline_mode = #tpu.pipeline_mode<synchronous>, transform_indices = @transform_2, window_bounds = array<i64: 1, 32>}, {pipeline_mode = #tpu.pipeline_mode<synchronous>, transform_indices = @transform_3, window_bounds = array<i64: 1, 32>}, {pipeline_mode = #tpu.pipeline_mode<synchronous>, transform_indices = @transform_4, window_bounds = array<i64: 16, 32>}, {pipeline_mode = #tpu.pipeline_mode<synchronous>, transform_indices = @transform_5, window_bounds = array<i64: 1, 32>}, {pipeline_mode = #tpu.pipeline_mode<synchronous>, transform_indices = @transform_6, window_bounds = array<i64: 1, 32>}, {transform_indices = @transform_7, window_bounds = array<i64: 4, 8, 16>}]} {
    %c0 = arith.constant 0 : index
    %c0_0 = arith.constant 0 : index
    %c0_1 = arith.constant 0 : index
    %0 = vector.load %arg1[%c0, %c0_0, %c0_1] : memref<4x8x16xf32, #tpu.memory_space<vmem>>, vector<4x8x16xf32>
    %c0_2 = arith.constant 0 : index
    %c0_3 = arith.constant 0 : index
    %1 = vector.load %arg2[%c0_2, %c0_3] : memref<16x32xf32, #tpu.memory_space<vmem>>, vector<16x32xf32>
    %c0_4 = arith.constant 0 : index
    %c0_5 = arith.constant 0 : index
    %2 = vector.load %arg3[%c0_4, %c0_5] : memref<1x32xf32, #tpu.memory_space<vmem>>, vector<1x32xf32>
    %c0_6 = arith.constant 0 : index
    %c0_7 = arith.constant 0 : index
    %3 = vector.load %arg4[%c0_6, %c0_7] : memref<1x32xf32, #tpu.memory_space<vmem>>, vector<1x32xf32>
    %4 = vector.shape_cast %0 : vector<4x8x16xf32> to vector<32x16xf32>
    %cst = arith.constant dense<0.000000e+00> : vector<32x32xf32>
    %5 = tpu.matmul %4, %1, %cst {dimension_numbers = #tpu.dot_dimension_numbers<[1], [0], [0], [1], [0, 0, 1, 1], [], []>} : vector<32x16xf32>, vector<16x32xf32>, vector<32x32xf32> -> vector<32x32xf32>
    %6 = vector.shape_cast %5 : vector<32x32xf32> to vector<4x8x32xf32>
    %cst_8 = arith.constant dense<0.000000e+00> : vector<4x32xf32>
    %7 = vector.multi_reduction <add>, %6, %cst_8 [1] : vector<4x8x32xf32> to vector<4x32xf32>
    %8 = vector.shape_cast %7 : vector<4x32xf32> to vector<4x1x32xf32>
    %cst_9 = arith.constant 8.000000e+00 : f32
    %9 = vector.broadcast %cst_9 : f32 to vector<4x1x32xf32>
    %10 = arith.divf %8, %9 : vector<4x1x32xf32>
    %11 = vector.broadcast %10 : vector<4x1x32xf32> to vector<4x8x32xf32>
    %12 = arith.subf %6, %11 : vector<4x8x32xf32>
    %13 = arith.mulf %12, %12 : vector<4x8x32xf32>
    %cst_10 = arith.constant dense<0.000000e+00> : vector<4x32xf32>
    %14 = vector.multi_reduction <add>, %13, %cst_10 [1] : vector<4x8x32xf32> to vector<4x32xf32>
    %15 = vector.shape_cast %14 : vector<4x32xf32> to vector<4x1x32xf32>
    %cst_11 = arith.constant 8.000000e+00 : f32
    %16 = vector.broadcast %cst_11 : f32 to vector<4x1x32xf32>
    %17 = arith.divf %15, %16 : vector<4x1x32xf32>
    %cst_12 = arith.constant 9.99999974E-6 : f32
    %18 = vector.broadcast %cst_12 : f32 to vector<4x1x32xf32>
    %19 = arith.addf %17, %18 : vector<4x1x32xf32>
    %20 = math.rsqrt %19 : vector<4x1x32xf32>
    %21 = vector.shape_cast %2 : vector<1x32xf32> to vector<1x1x32xf32>
    %22 = vector.broadcast %21 : vector<1x1x32xf32> to vector<4x1x32xf32>
    %23 = arith.mulf %22, %20 : vector<4x1x32xf32>
    %24 = arith.mulf %10, %23 : vector<4x1x32xf32>
    %25 = vector.shape_cast %3 : vector<1x32xf32> to vector<1x1x32xf32>
    %26 = vector.broadcast %25 : vector<1x1x32xf32> to vector<4x1x32xf32>
    %27 = arith.subf %26, %24 : vector<4x1x32xf32>
    %28 = vector.broadcast %23 : vector<4x1x32xf32> to vector<4x8x32xf32>
    %29 = arith.mulf %6, %28 : vector<4x8x32xf32>
    %30 = vector.broadcast %27 : vector<4x1x32xf32> to vector<4x8x32xf32>
    %31 = arith.addf %29, %30 : vector<4x8x32xf32>
    %32 = vector.extract_strided_slice %31 {offsets = [0, 0, 0], sizes = [4, 8, 16], strides = [1, 1, 1]} : vector<4x8x32xf32> to vector<4x8x16xf32>
    %33 = vector.extract_strided_slice %31 {offsets = [0, 0, 16], sizes = [4, 8, 16], strides = [1, 1, 1]} : vector<4x8x32xf32> to vector<4x8x16xf32>
    %34 = arith.negf %33 : vector<4x8x16xf32>
    %35 = math.exp %34 : vector<4x8x16xf32>
    %cst_13 = arith.constant 1.000000e+00 : f32
    %36 = vector.broadcast %cst_13 : f32 to vector<4x8x16xf32>
    %37 = arith.addf %36, %35 : vector<4x8x16xf32>
    %38 = arith.divf %36, %37 : vector<4x8x16xf32>
    %39 = arith.mulf %32, %38 : vector<4x8x16xf32>
    %c0_14 = arith.constant 0 : index
    %c0_15 = arith.constant 0 : index
    %40 = vector.load %arg5[%c0_14, %c0_15] : memref<16x32xf32, #tpu.memory_space<vmem>>, vector<16x32xf32>
    %c0_16 = arith.constant 0 : index
    %c0_17 = arith.constant 0 : index
    %41 = vector.load %arg6[%c0_16, %c0_17] : memref<1x32xf32, #tpu.memory_space<vmem>>, vector<1x32xf32>
    %c0_18 = arith.constant 0 : index
    %c0_19 = arith.constant 0 : index
    %42 = vector.load %arg7[%c0_18, %c0_19] : memref<1x32xf32, #tpu.memory_space<vmem>>, vector<1x32xf32>
    %43 = vector.shape_cast %39 : vector<4x8x16xf32> to vector<32x16xf32>
    %cst_20 = arith.constant dense<0.000000e+00> : vector<32x32xf32>
    %44 = tpu.matmul %43, %40, %cst_20 {dimension_numbers = #tpu.dot_dimension_numbers<[1], [0], [0], [1], [0, 0, 1, 1], [], []>} : vector<32x16xf32>, vector<16x32xf32>, vector<32x32xf32> -> vector<32x32xf32>
    %45 = vector.shape_cast %44 : vector<32x32xf32> to vector<4x8x32xf32>
    %cst_21 = arith.constant dense<0.000000e+00> : vector<4x32xf32>
    %46 = vector.multi_reduction <add>, %45, %cst_21 [1] : vector<4x8x32xf32> to vector<4x32xf32>
    %47 = vector.shape_cast %46 : vector<4x32xf32> to vector<4x1x32xf32>
    %cst_22 = arith.constant 8.000000e+00 : f32
    %48 = vector.broadcast %cst_22 : f32 to vector<4x1x32xf32>
    %49 = arith.divf %47, %48 : vector<4x1x32xf32>
    %50 = vector.broadcast %49 : vector<4x1x32xf32> to vector<4x8x32xf32>
    %51 = arith.subf %45, %50 : vector<4x8x32xf32>
    %52 = arith.mulf %51, %51 : vector<4x8x32xf32>
    %cst_23 = arith.constant dense<0.000000e+00> : vector<4x32xf32>
    %53 = vector.multi_reduction <add>, %52, %cst_23 [1] : vector<4x8x32xf32> to vector<4x32xf32>
    %54 = vector.shape_cast %53 : vector<4x32xf32> to vector<4x1x32xf32>
    %cst_24 = arith.constant 8.000000e+00 : f32
    %55 = vector.broadcast %cst_24 : f32 to vector<4x1x32xf32>
    %56 = arith.divf %54, %55 : vector<4x1x32xf32>
    %cst_25 = arith.constant 9.99999974E-6 : f32
    %57 = vector.broadcast %cst_25 : f32 to vector<4x1x32xf32>
    %58 = arith.addf %56, %57 : vector<4x1x32xf32>
    %59 = math.rsqrt %58 : vector<4x1x32xf32>
    %60 = vector.shape_cast %41 : vector<1x32xf32> to vector<1x1x32xf32>
    %61 = vector.broadcast %60 : vector<1x1x32xf32> to vector<4x1x32xf32>
    %62 = arith.mulf %61, %59 : vector<4x1x32xf32>
    %63 = arith.mulf %49, %62 : vector<4x1x32xf32>
    %64 = vector.shape_cast %42 : vector<1x32xf32> to vector<1x1x32xf32>
    %65 = vector.broadcast %64 : vector<1x1x32xf32> to vector<4x1x32xf32>
    %66 = arith.subf %65, %63 : vector<4x1x32xf32>
    %67 = vector.broadcast %62 : vector<4x1x32xf32> to vector<4x8x32xf32>
    %68 = arith.mulf %45, %67 : vector<4x8x32xf32>
    %69 = vector.broadcast %66 : vector<4x1x32xf32> to vector<4x8x32xf32>
    %70 = arith.addf %68, %69 : vector<4x8x32xf32>
    %71 = vector.extract_strided_slice %70 {offsets = [0, 0, 0], sizes = [4, 8, 16], strides = [1, 1, 1]} : vector<4x8x32xf32> to vector<4x8x16xf32>
    %72 = vector.extract_strided_slice %70 {offsets = [0, 0, 16], sizes = [4, 8, 16], strides = [1, 1, 1]} : vector<4x8x32xf32> to vector<4x8x16xf32>
    %73 = arith.negf %72 : vector<4x8x16xf32>
    %74 = math.exp %73 : vector<4x8x16xf32>
    %cst_26 = arith.constant 1.000000e+00 : f32
    %75 = vector.broadcast %cst_26 : f32 to vector<4x8x16xf32>
    %76 = arith.addf %75, %74 : vector<4x8x16xf32>
    %77 = arith.divf %75, %76 : vector<4x8x16xf32>
    %78 = arith.mulf %71, %77 : vector<4x8x16xf32>
    %79 = arith.addf %39, %78 : vector<4x8x16xf32>
    %cst_27 = arith.constant 0.707106769 : f32
    %80 = vector.broadcast %cst_27 : f32 to vector<4x8x16xf32>
    %81 = arith.mulf %79, %80 : vector<4x8x16xf32>
    %c0_28 = arith.constant 0 : index
    %c0_29 = arith.constant 0 : index
    %c0_30 = arith.constant 0 : index
    %82 = vector.load %arg8[%c0_28, %c0_29, %c0_30] : memref<4x8x16xf32, #tpu.memory_space<vmem>>, vector<4x8x16xf32>
    tpu.vector_store %arg8[%c0_28, %c0_29, %c0_30], %81 {strides = array<i32>} : memref<4x8x16xf32, #tpu.memory_space<vmem>>, vector<4x8x16xf32>,
    return
  }
  func.func @transform_0(%arg0: i32) -> (i32, i32, i32) {
    %c0_i32 = arith.constant 0 : i32
    %c0_i32_0 = arith.constant 0 : i32
    %c0_i32_1 = arith.constant 0 : i32
    return %arg0, %c0_i32, %c0_i32_0 : i32, i32, i32
  }
  func.func @transform_1(%arg0: i32) -> (i32, i32) {
    %c0_i32 = arith.constant 0 : i32
    %c0_i32_0 = arith.constant 0 : i32
    %c0_i32_1 = arith.constant 0 : i32
    return %c0_i32, %c0_i32_0 : i32, i32
  }
  func.func @transform_2(%arg0: i32) -> (i32, i32) {
    %c0_i32 = arith.constant 0 : i32
    %c0_i32_0 = arith.constant 0 : i32
    %c0_i32_1 = arith.constant 0 : i32
    return %c0_i32, %c0_i32_0 : i32, i32
  }
  func.func @transform_3(%arg0: i32) -> (i32, i32) {
    %c0_i32 = arith.constant 0 : i32
    %c0_i32_0 = arith.constant 0 : i32
    %c0_i32_1 = arith.constant 0 : i32
    return %c0_i32, %c0_i32_0 : i32, i32
  }
  func.func @transform_4(%arg0: i32) -> (i32, i32) {
    %c0_i32 = arith.constant 0 : i32
    %c0_i32_0 = arith.constant 0 : i32
    %c0_i32_1 = arith.constant 0 : i32
    return %c0_i32, %c0_i32_0 : i32, i32
  }
  func.func @transform_5(%arg0: i32) -> (i32, i32) {
    %c0_i32 = arith.constant 0 : i32
    %c0_i32_0 = arith.constant 0 : i32
    %c0_i32_1 = arith.constant 0 : i32
    return %c0_i32, %c0_i32_0 : i32, i32
  }
  func.func @transform_6(%arg0: i32) -> (i32, i32) {
    %c0_i32 = arith.constant 0 : i32
    %c0_i32_0 = arith.constant 0 : i32
    %c0_i32_1 = arith.constant 0 : i32
    return %c0_i32, %c0_i32_0 : i32, i32
  }
  func.func @transform_7(%arg0: i32) -> (i32, i32, i32) {
    %c0_i32 = arith.constant 0 : i32
    %c0_i32_0 = arith.constant 0 : i32
    %c0_i32_1 = arith.constant 0 : i32
    return %arg0, %c0_i32, %c0_i32_0 : i32, i32, i32
  }
}

</mosaic_0001>

<bundles_post_ra>
// kernel: tpu_custom_call.1
= control target key start
LH: loop header
LB: loop body
LE: loop exit
PB: predicated region body
PF: predicated region fallthrough
CT: control target
= control target key end

     0   :  { %s1781_s0 = inlined_call_operand.hbm [shape: f32[8,8,16], index: 0, kind: input, shape index: {}]   ;;  %s1782_s1 = inlined_call_operand.hbm [shape: f32[16,32], index: 1, kind: input, shape index: {}]   ;;  %s1783_s2 = inlined_call_operand.vmem [shape: f32[1,32], index: 2, kind: input, shape index: {}]   ;;  %s1784_s3 = inlined_call_operand.vmem [shape: f32[1,32], index: 3, kind: input, shape index: {}]   ;;  %s1785_s4 = inlined_call_operand.hbm [shape: f32[16,32], index: 4, kind: input, shape index: {}]   ;;  %s1786_s5 = inlined_call_operand.vmem [shape: f32[1,32], index: 5, kind: input, shape index: {}]   ;;  %s1787_s6 = inlined_call_operand.vmem [shape: f32[1,32], index: 6, kind: input, shape index: {}]   ;;  %s1788_s7 = inlined_call_operand.hbm [shape: f32[8,8,16], index: 7, kind: output, shape index: {}]  }
   0x1   :  { %1795 = sst [smem:[#allocation12_spill]] %s1782_s1 }
   0x2   :  { %12 = vsyncpa [#allocation3], 0 }
   0x3   :  { %14 = vsyncpa [#allocation3 + $0x1], 0 }
   0x4   :  { %15 = vsyncpa [#allocation6], 0 }
   0x5   :  { %16 = vsyncpa [#allocation4], 0 }
   0x6   :  { %18 = vsyncpa [#allocation4 + $0x1], 0  ;;  %s1426_s24 = smov 0   ;;  %s1428_s25 = smov 0  }
   0x7   :  { %s1430_s26 = smov 0   ;;  %s1432_s27 = smov 0  }
   0x8 LB: > { %s1447_s28 = sadd.s32 4294967295, %s1375_s27   ;;  %s1039_s29 = sadd.s32 4294967294, %s1375_s27   ;;  %s1375_s27 = sphi %s1432_s27, %s1815_s27   ;;  %s1371_s26 = sphi %s1430_s26, %s1814_s26   ;;  %s1367_s25 = sphi %s1428_s25, %s1813_s25   ;;  %s1363_s24 = sphi %s1426_s24, %s1812_s24  }
   0x9   : > { %p44_p0 = scmp.ne.s32.totalorder %s1367_s25, %s1363_s24  ;;  %p1790_p1 = scmp.eq.s32.totalorder %s1447_s28, 0 }
   0xa   : > { %p194_p2 = scmp.eq.s32.totalorder %s1447_s28, 1  ;;  %p200_p3 = scmp.eq.s32.totalorder %s1039_s29, 1 }
   0xb   : > { %p1456_p4 = por %p1790_p1, %p44_p0  ;;  %p1040_p5 = scmp.ge.s32.totalorder %s1375_s27, 1 }
   0xc   : > { %p1461_p6 = por %p200_p3, %p44_p0  ;;  %p207_p7 = scmp.lt.s32.totalorder %s1375_s27, 3 }
   0xd   : > { %s1796_s30 = scalar_select %p1456_p4, 1, 0 }
   0xe   : > { %s1797_s8 = scalar_select %p1461_p6, 1, 0 }
   0xf   : > { %p1466_p8 = pnand %p1040_p5, %p207_p7  ;;  %s1377_s10 = smov [#allocation5]  }
  0x10   : > { %s219_s11 = sshll.u32 %s1377_s10, 4  ;;  %s1378_s13 = smov [#allocation7]   ;;  %s220_s11 = int_to_ptr.vmem [resolvable:$true] %s219_s11 }
  0x11   : > { %s1798_s9 = scalar_select %p1466_p8, 1, 0 }
  0x12   : > { %p1119_p9 = pneg %p1466_p8  ;;  %s238_s14 = sshll.u32 %s1378_s13, 4  ;;  %s239_s14 = int_to_ptr.vmem [resolvable:$true] %s238_s14 }
  0x13   : > { %s1238_s15 = scalar_lea.vmem %s220_s11, 256  ;;  %p1246_p5 = scmp.lt.s32.totalorder %s220_s11, %s220_s11 }
  0x14   : > { %p1475_p11 = pnand %p1119_p9, %p1790_p1  ;;  %p1239_p13 = scmp.ne.s32.totalorder %s220_s11, %s1238_s15 }
  0x15   : > { %p1247_p7 = scmp.lt.s32.totalorder %s1238_s15, %s1238_s15 }
  0x16   : > { %p1229_p12 = pneg %p1475_p11 }
  0x17   : > { %p1248_p10 = por %p1247_p7, %p1246_p5 }
  0x18   : > { %p1241_p0 = pnand %p1239_p13, %p1229_p12 }
  0x1a   : > { %p1242_p3 = pneg %p1241_p0 }
  0x1c   : > { %p1249_p9 = pnand %p1248_p10, %p1242_p3 }
  0x1e   : > { %1252 = shalt.err (!%p1249_p9)
}
  0x1f   : > { %s1789_s16 = smov 128   ;;  %s1791_s17 = smov 8  }
  0x20   : > { %s1800_s1 = sld [smem:[#allocation12_spill]]  ;;  %s1264_s20 = scalar_lea.vmem %s239_s14, 256 }
  0x21   : > { %p1265_p13 = scmp.ne.s32.totalorder %s239_s14, %s1264_s20  ;;  %p1272_p10 = scmp.lt.s32.totalorder %s239_s14, %s239_s14 }
  0x22   : > { %p1273_p3 = scmp.lt.s32.totalorder %s1264_s20, %s1264_s20 }
  0x23   : > { %p1267_p0 = pnand %p1265_p13, %p1229_p12 }
  0x24   : > { %p1274_p7 = por %p1273_p3, %p1272_p10 }
  0x25   : > { %p1268_p5 = pneg %p1267_p0 }
  0x26   : > { %1122 = dma.hbm_to_vmem [thread:$0]  (!%p1475_p11), %s1800_s1, 256, %s220_s11, [#allocation6], %s1789_s16, %s1789_s16, %s1791_s17  }
  0x27   : > { %p1275_p9 = pnand %p1274_p7, %p1268_p5 }
  0x29   : > { %1278 = shalt.err (!%p1275_p9)
}
  0x2a   : > { %1125 = dma.hbm_to_vmem [thread:$0]  (!%p1475_p11), %s1785_s4, 256, %s239_s14, [#allocation6], %s1789_s16, %s1789_s16, %s1791_s17  }
  0x2b   : > { %s1504_s23 = sadd.s32 1, %s1375_s27   ;;  %s31_s29 = sadd.s32 1, %s1371_s26 }
  0x2c   : > { %s28_s10 = ssub.s32 %s1375_s27, %s1504_s23  ;;  %p38_p12 = scmp.ne.s32.totalorder %s1371_s26, %s1367_s25 }
  0x2d   : > { %p29_p13 = scmp.eq.s32.totalorder %s28_s10, 0  ;;  %p39_p0 = scmp.eq.s32.totalorder %s1375_s27, 0 }
  0x2e   : > { %p1514_p5 = por %p194_p2, %p38_p12  ;;  %p1136_p10 = scmp.lt.s32.totalorder %s1375_s27, 2 }
  0x2f   : > { %s1520_s12 = scalar_select %p29_p13, %s1371_s26, %s31_s29  }
  0x30   : > { %s1801_s11 = scalar_select %p1514_p5, 1, 0 }
  0x31   : > { %p40_p3 = por %p39_p0, %p38_p12  ;;  %s258_s13 = sand.u32 1, %s1371_s26  }
  0x32   : > { %s1044_s15 = sshll.u32 %s258_s13, 5  ;;  %s1073_s14 = sshll.u32 %s1375_s27, 9 }
  0x33   : > { %s1527_s20 = scalar_lea.hbm %s1781_s0, %s1073_s14  ;;  %s262_s21 = scalar_lea.vmem [#allocation2], %s1044_s15 }
  0x34   : > { %s269_s22 = sshll.u32 %s262_s21, 4  ;;  %p1531_p2 = pnand %p1136_p10, %p40_p3  ;;  %s1529_s22 = int_to_ptr.vmem [resolvable:$true] %s269_s22 }
  0x35   : > { %s1535_s29 = scalar_lea.sflag [#allocation3], %s258_s13  ;;  %s1279_s16 = scalar_lea.hbm %s1527_s20, 512 }
  0x36   : > { %p1280_p11 = scmp.ne.s32.totalorder %s1527_s20, %s1279_s16  ;;  %p1281_p7 = pneg %p1531_p2 }
  0x37   : > { %s1284_s15 = scalar_lea.hbm %s1781_s0, 1024  ;;  %p1285_p13 = scmp.lt.s32.totalorder %s1527_s20, %s1781_s0 }
  0x38   : > { %p1282_p9 = pnand %p1281_p7, %p1280_p11  ;;  %p1286_p0 = scmp.lt.s32.totalorder %s1284_s15, %s1279_s16 }
  0x3a   : > { %p1283_p12 = pneg %p1282_p9  ;;  %p1287_p10 = por %p1286_p0, %p1285_p13 }
  0x3c   : > { %p1288_p3 = pnand %p1287_p10, %p1283_p12 }
  0x3e   : > { %1291 = shalt.err (!%p1288_p3)
}
  0x3f   : > { %s1292_s13 = scalar_lea.vmem %s1529_s22, 512  ;;  %s1381_s17 = smov [#allocation2]  }
  0x40   : > { %p1293_p1 = scmp.ne.s32.totalorder %s1529_s22, %s1292_s13  ;;  %s1297_s1 = sshll.u32 %s1381_s17, 4  ;;  %s1298_s1 = int_to_ptr.vmem [resolvable:$false] %s1297_s1 }
  0x41   : > { %s1299_s14 = scalar_lea.vmem %s1298_s1, 1024  ;;  %p1300_p9 = scmp.lt.s32.totalorder %s1529_s22, %s1298_s1 }
  0x42   : > { %p1295_p6 = pnand %p1293_p1, %p1281_p7  ;;  %p1301_p5 = scmp.lt.s32.totalorder %s1299_s14, %s1292_s13 }
  0x44   : > { %p1296_p11 = pneg %p1295_p6  ;;  %p1302_p4 = por %p1301_p5, %p1300_p9 }
  0x46   : > { %p1303_p8 = pnand %p1302_p4, %p1296_p11 }
  0x48   : > { %1306 = shalt.err (!%p1303_p8)
}
  0x49   : > { %s1803_s16 = smov 8   ;;  %s1804_s18 = smov 128  }
  0x4a   : > { %1129 = dma.hbm_to_vmem [thread:$0]  (!%p1531_p2), %s1527_s20, 512, %s1529_s22, %s1535_s29, %s1804_s18, %s1804_s18, %s1803_s16  }
  0x4b   : > { %p1805_p1 = scmp.ne.s32.totalorder %s1798_s9, 0 }
  0x4c   : > { %s1562_s17 = sand.u32 (!%p1805_p1), 1, %s1367_s25   ;;  %p1806_p4 = scmp.ne.s32.totalorder (!%p1805_p1), %s1796_s30, 0 }
  0x4d   : > { %281 = sbr.rel (%p1805_p1) target bundleno = 925 (0x39d), region = 48  ;;  %s1048_s1 = sshll.u32 (!%p1805_p1), %s1562_s17, 5 }
  0x4e   : > { %s284_s15 = scalar_lea.sflag (!%p1805_p1), [#allocation3], %s1562_s17  ;;  %s287_s10 = scalar_lea.vmem (!%p1805_p1), [#allocation2], %s1048_s1 }
  0x52   : > { %1350 = dma.done.wait (%p1806_p4), %s284_s15, 512  }
  0x53   : > { %1352 = vsyncadd (%p1806_p4), %s284_s15, 4294966784  ;;  %p1807_p6 = scmp.eq.s32.totalorder %s1447_s28, 0 }
  0x55   : > { %1354 = dma.done.wait (%p1807_p6), [#allocation6], 512   ;;  %p1808_p8 = pmov %p1807_p6 }
  0x56   : > { %vm336_vm0 = vcmask 130048   ;;  %v333_v0 = vld [vmem:[#allocation5 + $0x8] sm:$0xff]  ;;  %v332_v1 = vld [vmem:[#allocation5] sm:$0xff]  ;;  %v330_v4 = vld [vmem:[%s287_s10 + $0x10] sm:$0xff]  ;;  %vm434_vm1 = vcmask 261120   ;;  %s1382_s29 = smov 112  }
  0x57   : > { %1356 = vsyncadd (%p1808_p8), [#allocation6], 4294966784  ;;  %v328_v2 = vld [vmem:[%s287_s10] sm:$0xff]  ;;  %1087 = vmatprep.subr.mxu0 %v333_v0  ;;  %v329_v3 = vld [vmem:[%s287_s10 + $0x8] sm:$0xff]  ;;  %s325_s16 = scalar_lea.vmem [#allocation8], %s1048_s1  ;;  %s1074_s15 = sshll.u32 %s1447_s28, 9 }
  0x58   : > { %1091 = vmatprep.mubr.msk.f32.mxu0 %vm336_vm0, %v328_v2  ;;  %1088 = vmatpush3.msra.mxu0 %v333_v0  ;;  %v331_v5 = vld [vmem:[%s287_s10 + $0x18] sm:$0xff]  ;;  %s947_s18 = sshll.u32 %s325_s16, 4  ;;  %s1736_s30 = scalar_lea.hbm %s1788_s7, %s1074_s15  ;;  %s1729_s18 = int_to_ptr.vmem [resolvable:$true] %s947_s18 }
  0x59   : > { %1089 = vmatprep.subr.mxu0 %v332_v1  ;;  %s934_s28 = scalar_lea.sflag [#allocation4], %s1562_s17  ;;  %s1307_s9 = scalar_lea.vmem %s1729_s18, 512 }
  0x5a   : > { %1090 = vmatpush3.msra.mxu0 %v332_v1  ;;  %p1308_p5 = scmp.ne.s32.totalorder %s1729_s18, %s1307_s9  ;;  %p1809_p2 = scmp.ne.s32.totalorder %s1801_s11, 0 }
  0x5b   : > { %1092 = vmatmul.mubr.msk.f32.vlgmr.msra.gmra.mxu0 %vm336_vm0, %v329_v3  ;;  %s1383_s20 = smov [#allocation8]  }
  0x5c   : > { %1094 = vmatprep.mubr.msk.f32.mxu0 %vm336_vm0, %v330_v4  ;;  %p1309_p7 = pnand %p1308_p5, %p1809_p2  ;;  %s1311_s22 = sshll.u32 %s1383_s20, 4  ;;  %s1312_s22 = int_to_ptr.vmem [resolvable:$false] %s1311_s22 }
  0x5d   : > { %p1314_p13 = scmp.lt.s32.totalorder %s1729_s18, %s1312_s22 }
  0x5e   : > { %p1310_p12 = pneg %p1309_p7 }
  0x5f   : > { %1095 = vmatmul.mubr.msk.f32.gmra.mxu0 %vm336_vm0, %v331_v5 }
 0x11b   : > { %v1580_v6 = vpop.f32.mrf.mxu0 }
 0x11c   : > { %v442_v7 = vsel %vm434_vm1, %v1580_v6, 0.0 }
 0x11d   : > { %v443_v8 = vrot.slane %v442_v7, 4  ;;  %v1584_v9 = vpop.f32.mrf.mxu0 }
 0x11e   : > { %v435_v10 = vsel %vm434_vm1, %v1584_v9, 0.0 }
 0x11f   : > { %v444_v11 = vadd.f32 %v443_v8, %v442_v7  ;;  %v436_v12 = vrot.slane %v435_v10, 4  ;;  %v1588_v13 = vpop.f32.mrf.mxu0 }
 0x120   : > { %v456_v14 = vsel %vm434_vm1, %v1588_v13, 0.0 }
 0x121   : > { %v445_v15 = vrot.slane %v444_v11, 2  ;;  %v437_v16 = vadd.f32 %v436_v12, %v435_v10  ;;  %v457_v17 = vrot.slane %v456_v14, 4  ;;  %v1592_v18 = vpop.f32.mrf.mxu0 }
 0x122   : > { %v449_v19 = vsel %vm434_vm1, %v1592_v18, 0.0 }
 0x123   : > { %v446_v20 = vadd.f32 %v445_v15, %v444_v11  ;;  %v438_v21 = vrot.slane %v437_v16, 2  ;;  %v458_v22 = vadd.f32 %v457_v17, %v456_v14  ;;  %v450_v23 = vrot.slane %v449_v19, 4 }
 0x125   : > { %v447_v24 = vrot.slane %v446_v20, 1  ;;  %v439_v25 = vadd.f32 %v438_v21, %v437_v16  ;;  %v459_v26 = vrot.slane %v458_v22, 2  ;;  %v451_v27 = vadd.f32 %v450_v23, %v449_v19 }
 0x127   : > { %v448_v28 = vadd.f32 %v447_v24, %v446_v20  ;;  %v440_v29 = vrot.slane %v439_v25, 1  ;;  %v460_v30 = vadd.f32 %v459_v26, %v458_v22  ;;  %v452_v31 = vrot.slane %v451_v27, 2 }
 0x129   : > { %v1596_v32 = vmul.f32 0.125, %v448_v28  ;;  %v441_v33 = vadd.f32 %v440_v29, %v439_v25  ;;  %v461_v34 = vrot.slane %v460_v30, 1  ;;  %v453_v35 = vadd.f32 %v452_v31, %v451_v27  ;;  %v334_v28 = vld [vmem:[%s1783_s2] sm:$0x1] }
 0x12a   : > { %v532_v25 = vlaneseq }
 0x12b   : > { %v469_v36 = vsub.f32 %v1580_v6, %v1596_v32  ;;  %v1600_v37 = vmul.f32 0.125, %v441_v33  ;;  %v462_v38 = vadd.f32 %v461_v34, %v460_v30  ;;  %v454_v39 = vrot.slane %v453_v35, 1  ;;  %v335_v34 = vld [vmem:[%s1784_s3] sm:$0x1] }
 0x12c   : > { %v533_v27 = vshrl.u32 %v532_v25, 7 }
 0x12d   : > { %v473_v40 = vmul.f32 %v469_v36, %v469_v36  ;;  %v468_v41 = vsub.f32 %v1584_v9, %v1600_v37  ;;  %v1604_v42 = vmul.f32 0.125, %v462_v38  ;;  %v455_v43 = vadd.f32 %v454_v39, %v453_v35 }
 0x12e   : > { %v1619_v29 = vsub.s32 0, %v533_v27 }
 0x12f   : > { %v483_v44 = vsel %vm434_vm1, %v473_v40, 0.0  ;;  %v472_v45 = vmul.f32 %v468_v41, %v468_v41  ;;  %v471_v46 = vsub.f32 %v1588_v13, %v1604_v42  ;;  %v1609_v47 = vmul.f32 0.125, %v455_v43 }
 0x130   : > { %v484_v48 = vrot.slane %v483_v44, 4 }
 0x131   : > { %v476_v49 = vsel %vm434_vm1, %v472_v45, 0.0  ;;  %v475_v50 = vmul.f32 %v471_v46, %v471_v46  ;;  %v470_v51 = vsub.f32 %v1592_v18, %v1609_v47 }
 0x132   : > { %v485_v52 = vadd.f32 %v484_v48, %v483_v44  ;;  %v477_v53 = vrot.slane %v476_v49, 4 }
 0x133   : > { %v497_v54 = vsel %vm434_vm1, %v475_v50, 0.0  ;;  %v474_v55 = vmul.f32 %v470_v51, %v470_v51 }
 0x134   : > { %v486_v56 = vrot.slane %v485_v52, 2  ;;  %v478_v57 = vadd.f32 %v477_v53, %v476_v49  ;;  %v498_v58 = vrot.slane %v497_v54, 4 }
 0x135   : > { %v490_v59 = vsel %vm434_vm1, %v474_v55, 0.0 }
 0x136   : > { %v487_v60 = vadd.f32 %v486_v56, %v485_v52  ;;  %v479_v61 = vrot.slane %v478_v57, 2  ;;  %v499_v62 = vadd.f32 %v498_v58, %v497_v54  ;;  %v491_v63 = vrot.slane %v490_v59, 4 }
 0x138   : > { %v488_v0 = vrot.slane %v487_v60, 1  ;;  %v480_v1 = vadd.f32 %v479_v61, %v478_v57  ;;  %v500_v2 = vrot.slane %v499_v62, 2  ;;  %v492_v3 = vadd.f32 %v491_v63, %v490_v59 }
 0x13a   : > { %v489_v4 = vadd.f32 %v488_v0, %v487_v60  ;;  %v481_v5 = vrot.slane %v480_v1, 1  ;;  %v501_v7 = vadd.f32 %v500_v2, %v499_v62  ;;  %v493_v8 = vrot.slane %v492_v3, 2 }
 0x13c   : > { %v505_v10 = vmul.f32 0.125, %v489_v4  ;;  %v482_v11 = vadd.f32 %v481_v5, %v480_v1  ;;  %v502_v12 = vrot.slane %v501_v7, 1  ;;  %v494_v14 = vadd.f32 %v493_v8, %v492_v3 }
 0x13e   : > { %v509_v15 = vadd.f32 1e-05, %v505_v10  ;;  %v504_v16 = vmul.f32 0.125, %v482_v11  ;;  %v503_v17 = vadd.f32 %v502_v12, %v501_v7  ;;  %v495_v19 = vrot.slane %v494_v14, 1  ;;  %v629_v7 = vld [vmem:[#allocation7 + $0x8] sm:$0xff]  ;;  %v628_v10 = vld [vmem:[#allocation7] sm:$0xff] }
 0x13f   : > { %1097 = vmatprep.subr.mxu1 %v629_v7 }
 0x140   : > { %1179 = vrsqrt.f32 %v509_v15  ;;  %v508_v20 = vadd.f32 1e-05, %v504_v16  ;;  %v507_v21 = vmul.f32 0.125, %v503_v17  ;;  %v496_v22 = vadd.f32 %v495_v19, %v494_v14  ;;  %1098 = vmatpush3.msra.mxu1 %v629_v7 }
 0x141   : > { %1099 = vmatprep.subr.mxu1 %v628_v10 }
 0x142   : > { %1181 = vrsqrt.f32 %v508_v20  ;;  %v511_v23 = vadd.f32 1e-05, %v507_v21  ;;  %v506_v24 = vmul.f32 0.125, %v496_v22  ;;  %1100 = vmatpush3.msra.mxu1 %v628_v10 }
 0x144   : > { %1183 = vrsqrt.f32 %v511_v23  ;;  %v510_v26 = vadd.f32 1e-05, %v506_v24 }
 0x146   : > { %1185 = vrsqrt.f32 %v510_v26 }
 0x14d   : > { %v1180_v30 = vpop.eup %1179 }
 0x14e   : > { %v517_v31 = vmul.f32 %v1180_v30, %v334_v28 }
 0x14f   : > { %v1182_v33 = vpop.eup %1181 }
 0x150   : > { %v521_v35 = vmul.f32 %v517_v31, %v1596_v32  ;;  %v539_v36 = vrot.slane %v517_v31, %v1619_v29  ;;  %v516_v38 = vmul.f32 %v1182_v33, %v334_v28 }
 0x151   : > { %v1184_v39 = vpop.eup %1183 }
 0x152   : > { %v525_v40 = vsub.f32 %v335_v34, %v521_v35  ;;  %v520_v41 = vmul.f32 %v516_v38, %v1600_v37  ;;  %v535_v43 = vrot.slane %v516_v38, %v1619_v29  ;;  %v519_v45 = vmul.f32 %v1184_v39, %v334_v28 }
 0x153   : > { %v1186_v44 = vpop.eup %1185  ;;  %v553_v46 = vmul.f32 %v1580_v6, %v539_v36 }
 0x154   : > { %v567_v48 = vrot.slane %v525_v40, %v1619_v29  ;;  %v524_v49 = vsub.f32 %v335_v34, %v520_v41  ;;  %v518_v50 = vmul.f32 %v1186_v44, %v334_v28  ;;  %v552_v51 = vmul.f32 %v535_v43, %v1584_v9 }
 0x155   : > { %v523_v32 = vmul.f32 %v519_v45, %v1604_v42  ;;  %v547_v52 = vrot.slane %v519_v45, %v1619_v29 }
 0x156   : > { %v581_v53 = vadd.f32 %v567_v48, %v553_v46  ;;  %v563_v54 = vrot.slane %v524_v49, %v1619_v29  ;;  %v522_v37 = vmul.f32 %v518_v50, %v1609_v47  ;;  %v543_v55 = vrot.slane %v518_v50, %v1619_v29 }
 0x157   : > { %v527_v56 = vsub.f32 %v335_v34, %v523_v32  ;;  %v555_v59 = vmul.f32 %v1588_v13, %v547_v52 }
 0x158   : > { %v1057_v57 = vmul.f32 -1.442695, %v581_v53  ;;  %v580_v6 = vadd.f32 %v563_v54, %v552_v51  ;;  %v526_v58 = vsub.f32 %v335_v34, %v522_v37  ;;  %v554_v42 = vmul.f32 %v543_v55, %v1592_v18 }
 0x159   : > { %v575_v60 = vrot.slane %v527_v56, %v1619_v29 }
 0x15a   : > { %v1056_v9 = vmul.f32 -1.442695, %v580_v6  ;;  %v571_v61 = vrot.slane %v526_v58, %v1619_v29  ;;  %1187 = vpow2.f32 %v1057_v57 }
 0x15b   : > { %v583_v62 = vadd.f32 %v575_v60, %v555_v59 }
 0x15c   : > { %1189 = vpow2.f32 %v1056_v9  ;;  %v582_v63 = vadd.f32 %v571_v61, %v554_v42 }
 0x15d   : > { %v1059_v47 = vmul.f32 -1.442695, %v583_v62 }
 0x15e   : > { %v1058_v0 = vmul.f32 -1.442695, %v582_v63 }
 0x15f   : > { %1191 = vpow2.f32 %v1059_v47 }
 0x160   : > { %1193 = vpow2.f32 %v1058_v0 }
 0x167   : > { %v1188_v1 = vpop.eup %1187 }
 0x168   : > { %v597_v4 = vadd.f32 1.0, %v1188_v1 }
 0x169   : > { %v1190_v2 = vpop.eup %1189 }
 0x16a   : > { %v596_v3 = vadd.f32 1.0, %v1190_v2 }
 0x16c   : > { %v1192_v13 = vpop.eup %1191  ;;  %1195 = vrcp.f32 %v596_v3 }
 0x16d   : > { %v1194_v5 = vpop.eup %1193  ;;  %1197 = vrcp.f32 %v597_v4  ;;  %v599_v18 = vadd.f32 1.0, %v1192_v13 }
 0x16e   : > { %v598_v8 = vadd.f32 1.0, %v1194_v5 }
 0x170   : > { %1199 = vrcp.f32 %v598_v8 }
 0x171   : > { %1201 = vrcp.f32 %v599_v18 }
 0x179   : > { %v1196_v11 = vpop.eup %1195 }
 0x17a   : > { %612 = vrot.lane.b32.xlu0 %v1196_v11, %s1382_s29  ;;  %v1198_v12 = vpop.eup %1197 }
 0x17d   : > { %v1200_v14 = vpop.eup %1199 }
 0x17e   : > { %614 = vrot.lane.b32.xlu0 %v1198_v12, %s1382_s29  ;;  %616 = vrot.lane.b32.xlu1 %v1200_v14, %s1382_s29  ;;  %v1202_v15 = vpop.eup %1201 }
 0x182   : > { %618 = vrot.lane.b32.xlu1 %v1202_v15, %s1382_s29 }
 0x1ec   : > { %v613_v16 = vpop.permute.xlu0 %612 }
 0x1ed   : > { %v1644_v17 = vmul.f32 %v613_v16, %v580_v6 }
 0x1ef   : > { %1101 = vmatprep.mubr.msk.f32.mxu1 %vm336_vm0, %v1644_v17 }
 0x1f0   : > { %v615_v19 = vpop.permute.xlu0 %614  ;;  %v617_v20 = vpop.permute.xlu1 %616 }
 0x1f1   : > { %v1648_v21 = vmul.f32 %v615_v19, %v581_v53  ;;  %v1650_v22 = vmul.f32 %v617_v20, %v582_v63 }
 0x1f3   : > { %1102 = vmatmul.mubr.msk.f32.vlgmr.msra.gmra.mxu1 %vm336_vm0, %v1648_v21 }
 0x1f4   : > { %1104 = vmatprep.mubr.msk.f32.mxu1 %vm336_vm0, %v1650_v22  ;;  %v619_v23 = vpop.permute.xlu1 %618 }
 0x1f5   : > { %v1656_v24 = vmul.f32 %v619_v23, %v583_v62 }
 0x1f7   : > { %1105 = vmatmul.mubr.msk.f32.gmra.mxu1 %vm336_vm0, %v1656_v24 }
 0x2b3   : > { %v1660_v25 = vpop.f32.mrf.mxu1 }
 0x2b4   : > { %v736_v26 = vsel %vm434_vm1, %v1660_v25, 0.0 }
 0x2b5   : > { %v737_v27 = vrot.slane %v736_v26, 4  ;;  %v1664_v28 = vpop.f32.mrf.mxu1 }
 0x2b6   : > { %v729_v30 = vsel %vm434_vm1, %v1664_v28, 0.0 }
 0x2b7   : > { %v738_v31 = vadd.f32 %v737_v27, %v736_v26  ;;  %v730_v33 = vrot.slane %v729_v30, 4  ;;  %v1668_v34 = vpop.f32.mrf.mxu1 }
 0x2b8   : > { %v750_v35 = vsel %vm434_vm1, %v1668_v34, 0.0 }
 0x2b9   : > { %v739_v36 = vrot.slane %v738_v31, 2  ;;  %v731_v38 = vadd.f32 %v730_v33, %v729_v30  ;;  %v751_v39 = vrot.slane %v750_v35, 4  ;;  %v1672_v40 = vpop.f32.mrf.mxu1 }
 0x2ba   : > { %v743_v41 = vsel %vm434_vm1, %v1672_v40, 0.0 }
 0x2bb   : > { %v740_v43 = vadd.f32 %v739_v36, %v738_v31  ;;  %v732_v44 = vrot.slane %v731_v38, 2  ;;  %v752_v45 = vadd.f32 %v751_v39, %v750_v35  ;;  %v744_v46 = vrot.slane %v743_v41, 4 }
 0x2bd   : > { %v741_v48 = vrot.slane %v740_v43, 1  ;;  %v733_v49 = vadd.f32 %v732_v44, %v731_v38  ;;  %v753_v50 = vrot.slane %v752_v45, 2  ;;  %v745_v51 = vadd.f32 %v744_v46, %v743_v41 }
 0x2bf   : > { %v742_v32 = vadd.f32 %v741_v48, %v740_v43  ;;  %v734_v52 = vrot.slane %v733_v49, 1  ;;  %v754_v53 = vadd.f32 %v753_v50, %v752_v45  ;;  %v746_v54 = vrot.slane %v745_v51, 2 }
 0x2c1   : > { %v1676_v37 = vmul.f32 0.125, %v742_v32  ;;  %v735_v55 = vadd.f32 %v734_v52, %v733_v49  ;;  %v755_v56 = vrot.slane %v754_v53, 1  ;;  %v747_v57 = vadd.f32 %v746_v54, %v745_v51  ;;  %v630_v54 = vld [vmem:[%s1786_s5] sm:$0x1] }
 0x2c3   : > { %v762_v6 = vsub.f32 %v1660_v25, %v1676_v37  ;;  %v1680_v58 = vmul.f32 0.125, %v735_v55  ;;  %v756_v59 = vadd.f32 %v755_v56, %v754_v53  ;;  %v748_v60 = vrot.slane %v747_v57, 1 }
 0x2c5   : > { %v766_v9 = vmul.f32 %v762_v6, %v762_v6  ;;  %v761_v42 = vsub.f32 %v1664_v28, %v1680_v58  ;;  %v1684_v61 = vmul.f32 0.125, %v756_v59  ;;  %v749_v62 = vadd.f32 %v748_v60, %v747_v57  ;;  %v631_v6 = vld [vmem:[%s1787_s6] sm:$0x1] }
 0x2c7   : > { %v776_v63 = vsel %vm434_vm1, %v766_v9, 0.0  ;;  %v765_v47 = vmul.f32 %v761_v42, %v761_v42  ;;  %v764_v0 = vsub.f32 %v1668_v34, %v1684_v61  ;;  %v1689_v1 = vmul.f32 0.125, %v749_v62 }
 0x2c8   : > { %v777_v2 = vrot.slane %v776_v63, 4 }
 0x2c9   : > { %v769_v3 = vsel %vm434_vm1, %v765_v47, 0.0  ;;  %v768_v4 = vmul.f32 %v764_v0, %v764_v0  ;;  %v763_v13 = vsub.f32 %v1672_v40, %v1689_v1 }
 0x2ca   : > { %v778_v5 = vadd.f32 %v777_v2, %v776_v63  ;;  %v770_v7 = vrot.slane %v769_v3, 4 }
 0x2cb   : > { %v790_v8 = vsel %vm434_vm1, %v768_v4, 0.0  ;;  %v767_v18 = vmul.f32 %v763_v13, %v763_v13 }
 0x2cc   : > { %v779_v10 = vrot.slane %v778_v5, 2  ;;  %v771_v11 = vadd.f32 %v770_v7, %v769_v3  ;;  %v791_v12 = vrot.slane %v790_v8, 4 }
 0x2cd   : > { %v783_v14 = vsel %vm434_vm1, %v767_v18, 0.0 }
 0x2ce   : > { %v780_v15 = vadd.f32 %v779_v10, %v778_v5  ;;  %v772_v16 = vrot.slane %v771_v11, 2  ;;  %v792_v19 = vadd.f32 %v791_v12, %v790_v8  ;;  %v784_v20 = vrot.slane %v783_v14, 4 }
 0x2d0   : > { %v781_v23 = vrot.slane %v780_v15, 1  ;;  %v773_v26 = vadd.f32 %v772_v16, %v771_v11  ;;  %v793_v27 = vrot.slane %v792_v19, 2  ;;  %v785_v30 = vadd.f32 %v784_v20, %v783_v14 }
 0x2d2   : > { %v782_v31 = vadd.f32 %v781_v23, %v780_v15  ;;  %v774_v33 = vrot.slane %v773_v26, 1  ;;  %v794_v35 = vadd.f32 %v793_v27, %v792_v19  ;;  %v786_v36 = vrot.slane %v785_v30, 2 }
 0x2d4   : > { %v798_v38 = vmul.f32 0.125, %v782_v31  ;;  %v775_v39 = vadd.f32 %v774_v33, %v773_v26  ;;  %v795_v41 = vrot.slane %v794_v35, 1  ;;  %v787_v43 = vadd.f32 %v786_v36, %v785_v30 }
 0x2d6   : > { %v802_v44 = vadd.f32 1e-05, %v798_v38  ;;  %v797_v45 = vmul.f32 0.125, %v775_v39  ;;  %v796_v46 = vadd.f32 %v795_v41, %v794_v35  ;;  %v788_v48 = vrot.slane %v787_v43, 1 }
 0x2d8   : > { %1203 = vrsqrt.f32 %v802_v44  ;;  %v801_v49 = vadd.f32 1e-05, %v797_v45  ;;  %v800_v50 = vmul.f32 0.125, %v796_v46  ;;  %v789_v51 = vadd.f32 %v788_v48, %v787_v43 }
 0x2da   : > { %1205 = vrsqrt.f32 %v801_v49  ;;  %v804_v32 = vadd.f32 1e-05, %v800_v50  ;;  %v799_v52 = vmul.f32 0.125, %v789_v51 }
 0x2dc   : > { %1207 = vrsqrt.f32 %v804_v32  ;;  %v803_v53 = vadd.f32 1e-05, %v799_v52 }
 0x2de   : > { %1209 = vrsqrt.f32 %v803_v53 }
 0x2e5   : > { %v1204_v55 = vpop.eup %1203 }
 0x2e6   : > { %v810_v56 = vmul.f32 %v1204_v55, %v630_v54 }
 0x2e7   : > { %v1206_v57 = vpop.eup %1205 }
 0x2e8   : > { %v814_v59 = vmul.f32 %v810_v56, %v1676_v37  ;;  %v832_v60 = vrot.slane %v810_v56, %v1619_v29  ;;  %v809_v9 = vmul.f32 %v1206_v57, %v630_v54 }
 0x2e9   : > { %v1208_v42 = vpop.eup %1207 }
 0x2ea   : > { %v818_v62 = vsub.f32 %v631_v6, %v814_v59  ;;  %v813_v63 = vmul.f32 %v809_v9, %v1680_v58  ;;  %v828_v47 = vrot.slane %v809_v9, %v1619_v29  ;;  %v812_v2 = vmul.f32 %v1208_v42, %v630_v54 }
 0x2eb   : > { %v1210_v0 = vpop.eup %1209  ;;  %v846_v3 = vmul.f32 %v1660_v25, %v832_v60 }
 0x2ec   : > { %v860_v4 = vrot.slane %v818_v62, %v1619_v29  ;;  %v817_v13 = vsub.f32 %v631_v6, %v813_v63  ;;  %v811_v5 = vmul.f32 %v1210_v0, %v630_v54  ;;  %v845_v7 = vmul.f32 %v828_v47, %v1664_v28 }
 0x2ed   : > { %v816_v37 = vmul.f32 %v812_v2, %v1684_v61  ;;  %v840_v8 = vrot.slane %v812_v2, %v1619_v29 }
 0x2ee   : > { %v874_v18 = vadd.f32 %v860_v4, %v846_v3  ;;  %v856_v10 = vrot.slane %v817_v13, %v1619_v29  ;;  %v815_v58 = vmul.f32 %v811_v5, %v1689_v1  ;;  %v836_v11 = vrot.slane %v811_v5, %v1619_v29 }
 0x2ef   : > { %v820_v12 = vsub.f32 %v631_v6, %v816_v37  ;;  %v848_v16 = vmul.f32 %v1668_v34, %v840_v8 }
 0x2f0   : > { %v1065_v14 = vmul.f32 -1.442695, %v874_v18  ;;  %v873_v25 = vadd.f32 %v856_v10, %v845_v7  ;;  %v819_v15 = vsub.f32 %v631_v6, %v815_v58  ;;  %v847_v61 = vmul.f32 %v836_v11, %v1672_v40 }
 0x2f1   : > { %v868_v19 = vrot.slane %v820_v12, %v1619_v29 }
 0x2f2   : > { %1211 = vpow2.f32 %v1065_v14  ;;  %v1064_v28 = vmul.f32 -1.442695, %v873_v25  ;;  %v864_v20 = vrot.slane %v819_v15, %v1619_v29 }
 0x2f3   : > { %v876_v23 = vadd.f32 %v868_v19, %v848_v16 }
 0x2f4   : > { %1213 = vpow2.f32 %v1064_v28  ;;  %v875_v26 = vadd.f32 %v864_v20, %v847_v61 }
 0x2f5   : > { %v1067_v1 = vmul.f32 -1.442695, %v876_v23 }
 0x2f6   : > { %v1066_v27 = vmul.f32 -1.442695, %v875_v26 }
 0x2f7   : > { %1215 = vpow2.f32 %v1067_v1 }
 0x2f8   : > { %1217 = vpow2.f32 %v1066_v27 }
 0x2ff   : > { %v1212_v30 = vpop.eup %1211 }
 0x300   : > { %v890_v31 = vadd.f32 1.0, %v1212_v30 }
 0x301   : > { %v1214_v33 = vpop.eup %1213 }
 0x302   : > { %1219 = vrcp.f32 %v890_v31  ;;  %v889_v34 = vadd.f32 1.0, %v1214_v33 }
 0x304   : > { %v1216_v35 = vpop.eup %1215  ;;  %1221 = vrcp.f32 %v889_v34 }
 0x305   : > { %v1218_v36 = vpop.eup %1217  ;;  %v892_v38 = vadd.f32 1.0, %v1216_v35 }
 0x306   : > { %v891_v39 = vadd.f32 1.0, %v1218_v36 }
 0x307   : > { %1223 = vrcp.f32 %v892_v38 }
 0x308   : > { %1225 = vrcp.f32 %v891_v39 }
 0x30f   : > { %v1220_v29 = vpop.eup %1219 }
 0x310   : > { %907 = vrot.lane.b32.xlu1 %v1220_v29, %s1382_s29 }
 0x311   : > { %v1222_v40 = vpop.eup %1221 }
 0x312   : > { %905 = vrot.lane.b32.xlu0 %v1222_v40, %s1382_s29 }
 0x314   : > { %v1224_v41 = vpop.eup %1223 }
 0x315   : > { %v1226_v43 = vpop.eup %1225  ;;  %911 = vrot.lane.b32.xlu1 %v1224_v41, %s1382_s29 }
 0x316   : > { %909 = vrot.lane.b32.xlu0 %v1226_v43, %s1382_s29  ;;  %s1313_s29 = scalar_lea.vmem %s1312_s22, 1024 }
 0x317   : > { %p1315_p0 = scmp.lt.s32.totalorder %s1313_s29, %s1307_s9 }
 0x319   : > { %p1316_p10 = por %p1315_p0, %p1314_p13 }
 0x31b   : > { %p1317_p3 = pnand %p1316_p10, %p1310_p12 }
 0x382   : > { %v908_v44 = vpop.permute.xlu1 %907 }
 0x383   : > { %v918_v45 = vmul.f32 %v908_v44, %v874_v18 }
 0x384   : > { %v906_v46 = vpop.permute.xlu0 %905 }
 0x385   : > { %v922_v48 = vadd.f32 %v918_v45, %v1648_v21  ;;  %v917_v49 = vmul.f32 %v906_v46, %v873_v25 }
 0x387   : > { %v926_v50 = vmul.f32 0.70710677, %v922_v48  ;;  %v921_v51 = vadd.f32 %v917_v49, %v1644_v17  ;;  %v912_v32 = vpop.permute.xlu1 %911 }
 0x388   : > { %v920_v52 = vmul.f32 %v912_v32, %v876_v23  ;;  %v910_v53 = vpop.permute.xlu0 %909 }
 0x389   : > { %930 = vst.msk [vmem:[%s325_s16 + $0x8] sm:$0xff] %vm336_vm0, %v926_v50  ;;  %v925_v54 = vmul.f32 0.70710677, %v921_v51  ;;  %v919_v55 = vmul.f32 %v910_v53, %v875_v26 }
 0x38a   : > { %v924_v56 = vadd.f32 %v920_v52, %v1656_v24 }
 0x38b   : > { %929 = vst.msk [vmem:[%s325_s16] sm:$0xff] %vm336_vm0, %v925_v54  ;;  %v923_v17 = vadd.f32 %v919_v55, %v1650_v22 }
 0x38c   : > { %v928_v21 = vmul.f32 0.70710677, %v924_v56 }
 0x38d   : > { %v927_v57 = vmul.f32 0.70710677, %v923_v17 }
 0x38e   : > { %932 = vst.msk [vmem:[%s325_s16 + $0x18] sm:$0xff] %vm336_vm0, %v928_v21 }
 0x38f   : > { %931 = vst.msk [vmem:[%s325_s16 + $0x10] sm:$0xff] %vm336_vm0, %v927_v57 }
 0x390   : > { %1320 = shalt.err (!%p1317_p3)
}
 0x391   : > { %s1321_s19 = scalar_lea.hbm %s1736_s30, 512  ;;  %s1325_s14 = scalar_lea.hbm %s1788_s7, 1024 }
 0x392   : > { %p1322_p11 = scmp.ne.s32.totalorder %s1736_s30, %s1321_s19  ;;  %p1326_p4 = scmp.lt.s32.totalorder %s1736_s30, %s1788_s7 }
 0x393   : > { %p1327_p6 = scmp.lt.s32.totalorder %s1325_s14, %s1321_s19 }
 0x394   : > { %p1323_p9 = pnand %p1322_p11, %p1809_p2 }
 0x395   : > { %p1328_p8 = por %p1327_p6, %p1326_p4 }
 0x396   : > { %p1324_p1 = pneg %p1323_p9 }
 0x398   : > { %p1329_p5 = pnand %p1328_p8, %p1324_p1 }
 0x39a   : > { %1332 = shalt.err (!%p1329_p5)
}
 0x39b   : > { %s1384_s1 = smov 128   ;;  %s1385_s10 = smov 8  }
 0x39c   : > { %1117 = dma.vmem_to_hbm [thread:$0]  (%p1809_p2), %s1729_s18, 512, %s1736_s30, %s934_s28, %s1384_s1, %s1384_s1, %s1385_s10  }
 0x39d PF: > { %s962_s9 = sand.u32 1, %s1363_s24   ;;  %p1810_p7 = scmp.ne.s32.totalorder %s1797_s8, 0 }
 0x39e   : > { %p1811_p12 = scmp.ge.s32.totalorder %s1375_s27, 2  ;;  %s963_s20 = scalar_lea.sflag [#allocation4], %s962_s9 }
 0x3a0   : > { %p1131_p13 = pnand %p1811_p12, %p1810_p7 }
 0x3a2   : > { %p1132_p0 = pneg %p1131_p13 }
 0x3a4   : > { %1358 = dma.done.wait (%p1132_p0), %s963_s20, 512  }
 0x3a5   : > { %1360 = vsyncadd (%p1132_p0), %s963_s20, 4294966784  ;;  %p21_p10 = scmp.ge.s32.totalorder %s1504_s23, 4   ;;  %s1812_s24 = smov %s1367_s25 }
 0x3a6   : > { %s1813_s25 = smov %s1371_s26  ;;  %s1814_s26 = smov %s1520_s12 }
 0x3a7   : > { %s1815_s27 = smov %s1504_s23  ;;  %23 = sbr.rel (!%p21_p10) target bundleno = 8 (0x8), region = 101 }
 0x3ac   :  { %968 = vsyncpa [#allocation3], 1 }
 0x3ad   :  { %970 = vsyncpa [#allocation3 + $0x1], 1 }
 0x3ae   :  { %971 = vsyncpa [#allocation6], 1 }
 0x3af   :  { %972 = vsyncpa [#allocation4], 1 }
 0x3b0   :  { %974 = vsyncpa [#allocation4 + $0x1], 1 }

</bundles_post_ra>
